<compile_context>
chip_gen: v7x
topology: tpu7x:2x2x1
jax: 0.10.0
libtpu: 0.0.40
codegen_flags: <defaults>
</compile_context>

<pallas_src>
import jax
import jax.numpy as jnp
from jax.experimental import pallas as pl
from jax.experimental.pallas import tpu as pltpu

D_IRT = 1.702          # irt3pl default discrimination scaling constant
SUBLANES = 8
LANES = 128
MAX_BLOCK_ROWS = 2048  # (2048, 4*128) f32 in + (2048, 128) f32 out ≈ 10 MiB dbl-buffered
TINY_BATCH = SUBLANES * LANES  # below this, skip the kernel entirely


def _round_up(x, m):
    return -(-x // m) * m


def _sigmoid(x):
    # tanh-based sigmoid: transcendental goes to the EUP slot, f32-safe on v5e.
    return 0.5 * (jnp.tanh(0.5 * x) + 1.0)


def _irt_kernel(x_ref, out_ref):
    # x_ref: (block_rows, 4*128) f32 — [theta | a | b | c] lane groups.
    theta = x_ref[:, 0 * LANES:1 * LANES]
    a = x_ref[:, 1 * LANES:2 * LANES]
    b = x_ref[:, 2 * LANES:3 * LANES]
    c = x_ref[:, 3 * LANES:4 * LANES]
    z = _sigmoid(D_IRT * a * (theta - b))   # 3PL logistic term
    p = c + (1.0 - c) * z                   # 3PL probability
    out_ref[...] = _sigmoid(p)              # outer sigmoid from IRTNet.forward


@jax.jit
def irtnet_forward(params, user, item):
    """params: dict of ('theta','a','b','c') -> (num, 1) f32 embedding tables."""
    # --- glue: embedding gathers (nn.Embedding(...)(idx).squeeze(-1)) ---
    theta = params["theta"][user, 0]   # (B,)
    a = params["a"][item, 0]           # (B,)
    b = params["b"][item, 0]           # (B,)
    c = params["c"][item, 0]           # (B,)

    batch = user.shape[0]

    # Tiny-batch fallback: kernel dispatch + pad-to-(8,128) is pure overhead.
    if batch < TINY_BATCH:
        return _sigmoid(c + (1.0 - c) * _sigmoid(D_IRT * a * (theta - b)))

    rows_needed = pl.cdiv(batch, LANES)
    # Force >= 2 grid blocks when possible so ("parallel",) shards across the
    # two TensorCores on v7x; collapse to 1 block otherwise.
    target_blocks = 2 if rows_needed >= 2 * SUBLANES else 1
    block_rows = min(MAX_BLOCK_ROWS,
                     _round_up(pl.cdiv(rows_needed, target_blocks), SUBLANES))
    rows = _round_up(rows_needed, block_rows)
    n_blocks = rows // block_rows
    # NOTE: block_rows depends on the batch size, so each new batch size
    # retraces/recompiles; bucket batch sizes in production if that matters.

    pad = rows * LANES - batch

    def plane(v):
        return jnp.pad(v, (0, pad)).reshape(rows, LANES)

    # One lane-dense contiguous slab: (rows, 4*128) = [theta | a | b | c].
    # With allow_input_fusion, XLA may generate this directly into the kernel's
    # input DMA instead of materializing it in HBM.
    slab = jnp.concatenate([plane(theta), plane(a), plane(b), plane(c)], axis=1)

    out2d = pl.pallas_call(
        _irt_kernel,
        out_shape=jax.ShapeDtypeStruct((rows, LANES), jnp.float32),
        grid=(n_blocks,),
        in_specs=[pl.BlockSpec((block_rows, 4 * LANES), lambda i: (i, 0))],
        out_specs=pl.BlockSpec((block_rows, LANES), lambda i: (i, 0)),
        compiler_params=pltpu.CompilerParams(
            dimension_semantics=("parallel",),
            allow_input_fusion=[True],
        ),
    )(slab)

    return out2d.reshape(-1)[:batch]   # (B,)


def _reference_forward(params, user, item):
    theta = params["theta"][user, 0]
    a = params["a"][item, 0]
    b = params["b"][item, 0]
    c = params["c"][item, 0]
    p = c + (1.0 - c) * jax.nn.sigmoid(D_IRT * a * (theta - b))
    return jax.nn.sigmoid(p)


def init_params(key, user_num, item_num):
    # nn.Embedding default init: N(0, 1)
    k1, k2, k3, k4 = jax.random.split(key, 4)
    return {
        "theta": jax.random.normal(k1, (user_num, 1), jnp.float32),
        "a": jax.random.normal(k2, (item_num, 1), jnp.float32),
        "b": jax.random.normal(k3, (item_num, 1), jnp.float32),
        "c": jax.random.normal(k4, (item_num, 1), jnp.float32),
    }


if __name__ == "__main__":
    user_num, item_num = 64, 32
    batch = 2000   # >= 8*128 so the Pallas path (2-block grid) is exercised

    key = jax.random.PRNGKey(0)
    pkey, ukey, ikey = jax.random.split(key, 3)

    params = init_params(pkey, user_num, item_num)
    user = jax.random.randint(ukey, (batch,), 0, user_num, dtype=jnp.int32)
    item = jax.random.randint(ikey, (batch,), 0, item_num, dtype=jnp.int32)

    out = jax.block_until_ready(irtnet_forward(params, user, item))
    ref = _reference_forward(params, user, item)
    assert out.shape == (batch,)
    assert jnp.allclose(out, ref, atol=1e-5, rtol=1e-5), float(
        jnp.max(jnp.abs(out - ref)))

    # Also exercise the tiny-batch pure-XLA fallback path.
    out_small = jax.block_until_ready(irtnet_forward(params, user[:16], item[:16]))
    assert jnp.allclose(out_small, ref[:16], atol=1e-5, rtol=1e-5)

    print("KERNEL_OK")
</pallas_src>

<mosaic_0001>
module attributes {stable_mosaic.version = 11 : i64} {
  func.func @_irt_kernel(%arg0: i32, %arg1: memref<8x512xf32, #tpu.memory_space<vmem>>, %arg2: memref<8x128xf32, #tpu.memory_space<vmem>>) attributes {dimension_semantics = [#tpu.dimension_semantics<parallel>], iteration_bounds = array<i64: 2>, scalar_prefetch = 0 : i64, scratch_operands = 0 : i64, tpu.core_type = #tpu.core_type<tc>, window_params = [{transform_indices = @transform_0, window_bounds = array<i64: 8, 512>}, {transform_indices = @transform_1, window_bounds = array<i64: 8, 128>}]} {
    %c0 = arith.constant 0 : index
    %c0_0 = arith.constant 0 : index
    %0 = vector.load %arg1[%c0, %c0_0] : memref<8x512xf32, #tpu.memory_space<vmem>>, vector<8x128xf32>
    %c0_1 = arith.constant 0 : index
    %c128 = arith.constant 128 : index
    %1 = vector.load %arg1[%c0_1, %c128] : memref<8x512xf32, #tpu.memory_space<vmem>>, vector<8x128xf32>
    %c0_2 = arith.constant 0 : index
    %c256 = arith.constant 256 : index
    %2 = vector.load %arg1[%c0_2, %c256] : memref<8x512xf32, #tpu.memory_space<vmem>>, vector<8x128xf32>
    %c0_3 = arith.constant 0 : index
    %c384 = arith.constant 384 : index
    %3 = vector.load %arg1[%c0_3, %c384] : memref<8x512xf32, #tpu.memory_space<vmem>>, vector<8x128xf32>
    %cst = arith.constant 1.702000e+00 : f32
    %4 = vector.broadcast %cst : f32 to vector<8x128xf32>
    %5 = arith.mulf %4, %1 : vector<8x128xf32>
    %6 = arith.subf %0, %2 : vector<8x128xf32>
    %7 = arith.mulf %5, %6 : vector<8x128xf32>
    %cst_4 = arith.constant 5.000000e-01 : f32
    %8 = vector.broadcast %cst_4 : f32 to vector<8x128xf32>
    %9 = arith.mulf %8, %7 : vector<8x128xf32>
    %10 = math.tanh %9 : vector<8x128xf32>
    %cst_5 = arith.constant 1.000000e+00 : f32
    %11 = vector.broadcast %cst_5 : f32 to vector<8x128xf32>
    %12 = arith.addf %10, %11 : vector<8x128xf32>
    %cst_6 = arith.constant 5.000000e-01 : f32
    %13 = vector.broadcast %cst_6 : f32 to vector<8x128xf32>
    %14 = arith.mulf %13, %12 : vector<8x128xf32>
    %cst_7 = arith.constant 1.000000e+00 : f32
    %15 = vector.broadcast %cst_7 : f32 to vector<8x128xf32>
    %16 = arith.subf %15, %3 : vector<8x128xf32>
    %17 = arith.mulf %16, %14 : vector<8x128xf32>
    %18 = arith.addf %3, %17 : vector<8x128xf32>
    %cst_8 = arith.constant 5.000000e-01 : f32
    %19 = vector.broadcast %cst_8 : f32 to vector<8x128xf32>
    %20 = arith.mulf %19, %18 : vector<8x128xf32>
    %21 = math.tanh %20 : vector<8x128xf32>
    %cst_9 = arith.constant 1.000000e+00 : f32
    %22 = vector.broadcast %cst_9 : f32 to vector<8x128xf32>
    %23 = arith.addf %21, %22 : vector<8x128xf32>
    %cst_10 = arith.constant 5.000000e-01 : f32
    %24 = vector.broadcast %cst_10 : f32 to vector<8x128xf32>
    %25 = arith.mulf %24, %23 : vector<8x128xf32>
    %c0_11 = arith.constant 0 : index
    %c0_12 = arith.constant 0 : index
    %26 = vector.load %arg2[%c0_11, %c0_12] : memref<8x128xf32, #tpu.memory_space<vmem>>, vector<8x128xf32>
    tpu.vector_store %arg2[%c0_11, %c0_12], %25 {strides = array<i32>} : memref<8x128xf32, #tpu.memory_space<vmem>>, vector<8x128xf32>,
    return
  }
  func.func @transform_0(%arg0: i32) -> (i32, i32) {
    %c0_i32 = arith.constant 0 : i32
    %c0_i32_0 = arith.constant 0 : i32
    return %arg0, %c0_i32 : i32, i32
  }
  func.func @transform_1(%arg0: i32) -> (i32, i32) {
    %c0_i32 = arith.constant 0 : i32
    %c0_i32_0 = arith.constant 0 : i32
    return %arg0, %c0_i32 : i32, i32
  }
}

</mosaic_0001>

<bundles_post_ra>
// kernel: irtnet_forward.2
= control target key start
LH: loop header
LB: loop body
LE: loop exit
PB: predicated region body
PF: predicated region fallthrough
CT: control target
= control target key end

     0   :  { %s816_s0 = inlined_call_operand.vmem [shape: f32[16,128], index: 0, kind: input, shape index: {}]   ;;  %s817_s1 = inlined_call_operand.<no memory space> [shape: f32[], index: 1, kind: input, shape index: {}]   ;;  %s818_s2 = inlined_call_operand.vmem [shape: f32[16,128], index: 2, kind: input, shape index: {}]   ;;  %s819_s3 = inlined_call_operand.vmem [shape: f32[16,128], index: 3, kind: input, shape index: {}]   ;;  %s820_s4 = inlined_call_operand.vmem [shape: f32[16,128], index: 4, kind: input, shape index: {}]   ;;  %s821_s5 = inlined_call_operand.hbm [shape: f32[16,128], index: 5, kind: output, shape index: {}]  }
   0x1   :  { %v696_v0 = vstv %s817_s1 }
   0x2   :  { %14 = vsyncpa [#allocation23], 0 }
   0x3   :  { %16 = vsyncpa [#allocation23 + $0x1], 0  ;;  %s698_s20 = smov 0   ;;  %s700_s21 = smov 0  }
   0x4   :  { %s702_s22 = smov 0   ;;  %s704_s23 = smov 0  }
   0x5 LB: > { %s719_s1 = sadd.s32 4294967295, %s660_s23   ;;  %s542_s24 = sadd.s32 4294967294, %s660_s23   ;;  %s660_s23 = sphi %s704_s23, %s827_s23   ;;  %s656_s22 = sphi %s702_s22, %s826_s22   ;;  %s652_s21 = sphi %s700_s21, %s825_s21   ;;  %s648_s20 = sphi %s698_s20, %s824_s20  }
   0x6   : > { %s723_s25 = sadd.s32 1, %s660_s23   ;;  %s145_s26 = sadd.s32 1, %s656_s22 }
   0x7   : > { %s142_s27 = ssub.s32 %s660_s23, %s723_s25  ;;  %p155_p0 = scmp.ne.s32.totalorder %s656_s22, %s652_s21 }
   0x8   : > { %p143_p1 = scmp.eq.s32.totalorder %s142_s27, 0  ;;  %p156_p2 = scmp.eq.s32.totalorder %s719_s1, 1 }
   0x9   : > { %p161_p3 = scmp.ne.s32.totalorder %s652_s21, %s648_s20  ;;  %p162_p4 = scmp.eq.s32.totalorder %s542_s24, 1 }
   0xa   : > { %s734_s28 = scalar_select %p143_p1, %s656_s22, %s145_s26  }
   0xb   : > { %p736_p5 = por %p156_p2, %p155_p0  ;;  %p740_p6 = por %p162_p4, %p161_p3 }
   0xc   : > { %p545_p7 = scmp.ge.s32.totalorder %s660_s23, 1  ;;  %p235_p8 = scmp.lt.s32.totalorder %s660_s23, 3 }
   0xe   : > { %p236_p9 = pnand %p545_p7, %p235_p8 }
   0xf   : > { %p293_p10 = scmp.lt.s32.totalorder (!%p236_p9), %s719_s1, 1  ;;  %s287_s24 = sand.u32 (!%p236_p9), 1, %s652_s21  }
  0x10   : > { %239 = sbr.rel (%p236_p9) target bundleno = 92 (0x5c), region = 36  ;;  %s546_s26 = sshll.u32 (!%p236_p9), %s287_s24, 3 }
  0x11   : > { %s552_s27 = sshll.u32 (!%p236_p9), %s719_s1, 7  ;;  %s425_s11 = scalar_lea.sflag (!%p236_p9), [#allocation23], %s287_s24 }
  0x17   : > { %s294_s6 = scalar_select %p293_p10, %s719_s1, 1 }
  0x18   : > { %s662_s1 = smov [#allocation22]  }
  0x19   : > { %s547_s7 = sshll.u32 %s294_s6, 3  ;;  %s289_s6 = scalar_lea.vmem [#allocation22], %s546_s26 }
  0x1a   : > { %s312_s10 = scalar_lea.vmem %s818_s2, %s547_s7  ;;  %s325_s13 = scalar_lea.vmem %s819_s3, %s547_s7 }
  0x1b   : > { %s332_s16 = scalar_lea.vmem %s820_s4, %s547_s7  ;;  %v340_v1 = vld [vmem:[%s312_s10] sm:$0xff]  ;;  %s299_s19 = scalar_lea.vmem %s816_s0, %s547_s7 }
  0x1c   : > { %v344_v2 = vld [vmem:[%s325_s13] sm:$0xff]  ;;  %v381_v4 = vmax.f32 %v696_v0, %v340_v1  ;;  %s438_s8 = sshll.u32 %s289_s6, 4  ;;  %s774_s10 = scalar_lea.hbm %s821_s5, %s552_s27  ;;  %s776_s8 = int_to_ptr.vmem [resolvable:$true] %s438_s8 }
  0x1d   : > { %v345_v3 = vld [vmem:[%s332_s16] sm:$0xff]  ;;  %v362_v6 = vmax.f32 %v696_v0, %v344_v2  ;;  %s598_s12 = scalar_lea.vmem %s776_s8, 128  ;;  %s602_s13 = sshll.u32 %s662_s1, 4  ;;  %s603_s13 = int_to_ptr.vmem [resolvable:$false] %s602_s13 }
  0x1e   : > { %v348_v5 = vmax.f32 %v345_v3, %v696_v0  ;;  %v385_v9 = vmax.f32 %v381_v4, %v696_v0  ;;  %v336_v16 = vld [vmem:[%s299_s19] sm:$0xff]  ;;  %p599_p11 = scmp.ne.s32.totalorder %s776_s8, %s598_s12  ;;  %s604_s14 = scalar_lea.vmem %s603_s13, 256 }
  0x1f   : > { %v366_v8 = vmax.f32 %v362_v6, %v696_v0  ;;  %v400_v17 = vmax.f32 %v696_v0, %v336_v16  ;;  %p605_p0 = scmp.lt.s32.totalorder %s776_s8, %s603_s13  ;;  %p606_p1 = scmp.lt.s32.totalorder %s604_s14, %s598_s12 }
  0x20   : > { %v352_v7 = vmax.f32 %v348_v5, %v696_v0  ;;  %p600_p12 = pnand %p599_p11, %p736_p5 }
  0x21   : > { %v370_v11 = vmax.f32 %v366_v8, %v696_v0  ;;  %v416_v20 = vsub.f32 1.0, %v400_v17  ;;  %p607_p2 = por %p606_p1, %p605_p0 }
  0x22   : > { %v356_v10 = vmax.f32 %v352_v7, %v696_v0  ;;  %p601_p13 = pneg %p600_p12 }
  0x23   : > { %v409_v12 = vmul.f32 1.702, %v370_v11 }
  0x24   : > { %v410_v13 = vsub.f32 %v356_v10, %v385_v9  ;;  %p608_p3 = pnand %p607_p2, %p601_p13 }
  0x26   : > { %v411_v14 = vmul.f32 %v410_v13, %v409_v12 }
  0x28   : > { %v412_v15 = vmul.f32 0.5, %v411_v14 }
  0x2a   : > { %594 = vtanh.f32 %v412_v15 }
  0x34   : > { %v595_v18 = vpop.eup %594 }
  0x35   : > { %v414_v19 = vadd.f32 1.0, %v595_v18 }
  0x37   : > { %v415_v21 = vmul.f32 0.5, %v414_v19 }
  0x39   : > { %v417_v22 = vmul.f32 %v416_v20, %v415_v21 }
  0x3b   : > { %v418_v23 = vadd.f32 %v417_v22, %v400_v17 }
  0x3d   : > { %v419_v24 = vmul.f32 0.5, %v418_v23 }
  0x3f   : > { %596 = vtanh.f32 %v419_v24 }
  0x49   : > { %v597_v25 = vpop.eup %596 }
  0x4a   : > { %v421_v26 = vadd.f32 1.0, %v597_v25 }
  0x4c   : > { %v422_v27 = vmul.f32 0.5, %v421_v26 }
  0x4e   : > { %423 = vst [vmem:[%s289_s6] sm:$0xff] %v422_v27 }
  0x4f   : > { %611 = shalt.err (!%p608_p3)
}
  0x50   : > { %s612_s15 = scalar_lea.hbm %s774_s10, 128  ;;  %s616_s18 = scalar_lea.hbm %s821_s5, 256 }
  0x51   : > { %p613_p4 = scmp.ne.s32.totalorder %s774_s10, %s612_s15  ;;  %p617_p9 = scmp.lt.u32.totalorder %s774_s10, %s821_s5 }
  0x52   : > { %p618_p10 = scmp.lt.u32.totalorder %s616_s18, %s612_s15  ;;  %p620_p12 = scmp.lt.u32.totalorder %s612_s15, %s774_s10 }
  0x53   : > { %p614_p7 = pnand %p613_p4, %p736_p5 }
  0x54   : > { %p619_p11 = por %p618_p10, %p617_p9 }
  0x55   : > { %p615_p8 = pneg %p614_p7 }
  0x56   : > { %p621_p13 = por %p620_p12, %p619_p11 }
  0x58   : > { %p622_p0 = pnand %p621_p13, %p615_p8 }
  0x5a   : > { %625 = shalt.err (!%p622_p0)
}
  0x5b   : > { %555 = dma.vmem_to_hbm [thread:$0]  (%p736_p5), %s776_s8, 128, %s774_s10, %s425_s11  }
  0x5c PF: > { %p561_p1 = scmp.ge.s32.totalorder %s660_s23, 2  ;;  %s450_s26 = sand.u32 1, %s648_s20  }
  0x5d   : > { %s451_s27 = scalar_lea.sflag [#allocation23], %s450_s26 }
  0x5e   : > { %p558_p2 = pnand %p561_p1, %p740_p6 }
  0x60   : > { %643 = dma.done.wait (!%p558_p2), %s451_s27, 128  }
  0x61   : > { %645 = vsyncadd (!%p558_p2), %s451_s27, 4294967168  ;;  %p19_p3 = scmp.ge.s32.totalorder %s723_s25, 4   ;;  %s824_s20 = smov %s652_s21 }
  0x62   : > { %s825_s21 = smov %s656_s22  ;;  %s826_s22 = smov %s734_s28 }
  0x63   : > { %s827_s23 = smov %s723_s25  ;;  %21 = sbr.rel (!%p19_p3) target bundleno = 5 (0x5), region = 83 }
  0x6a   :  { %456 = vsyncpa [#allocation23], 1 }
  0x6b   :  { %458 = vsyncpa [#allocation23 + $0x1], 1 }

</bundles_post_ra>
